<compile_context>
chip_gen: v6e
topology: v6e:2x2x1
jax: 0.10.0
libtpu: 0.0.40
codegen_flags: <defaults>
</compile_context>

<pallas_src>
import jax
import jax.numpy as jnp
from jax.experimental import pallas as pl
from jax.experimental.pallas import tpu as pltpu

_VMEM_LIMIT_BYTES = 32 * 1024 * 1024   # explicit scoped-VMEM request; safe on v5e/v6e/v7x
_VMEM_BUDGET = int(0.75 * _VMEM_LIMIT_BYTES)
_MAX_COL_TILE = 512                    # output-lane tile (multiple of 128) once Lout > 512
_MAX_ROW_BLOCK = 1024                  # 512-1024 row tiles sit near the HBM roofline


def _round_up(x, m):
    return ((x + m - 1) // m) * m


# ------------------------------ Pallas kernel ------------------------------ #

def _up2_kernel(x_ref, m_ref, o_ref):
    # x_ref: (br, L)   rows = folded batch*channel, lanes = input length
    # m_ref: (L, tn)   constant 2-tap blend column-tile (bf16 by default)
    # o_ref: (br, tn)  lane-dense output column-tile
    x = x_ref[...].astype(m_ref.dtype)
    o_ref[...] = jnp.dot(x, m_ref[...],
                         preferred_element_type=jnp.float32).astype(o_ref.dtype)


# ------------------------------- op wrapper -------------------------------- #

def _interp_matrix(L, dtype):
    """(L, 2L) matrix for linear 2x upsampling with align_corners=True.

    Column j holds (1-frac) at row i0 and frac at row i0+1 where
    pos = j*(L-1)/(2L-1), i0 = clip(floor(pos), 0, L-2), frac = pos - i0.
    Pure function of the static shape -> constant-folded by XLA under jit.
    """
    Lout = 2 * L
    pos = jnp.arange(Lout, dtype=jnp.float32) * ((L - 1) / (Lout - 1))
    i0 = jnp.clip(jnp.floor(pos).astype(jnp.int32), 0, max(L - 2, 0))
    i1 = jnp.minimum(i0 + 1, L - 1)
    frac = pos - i0.astype(jnp.float32)
    rows = jnp.arange(L, dtype=jnp.int32)[:, None]
    m = ((rows == i0[None, :]) * (1.0 - frac)[None, :]
         + (rows == i1[None, :]) * frac[None, :])
    return m.astype(dtype)


def up2(u, *, operand_dtype=jnp.bfloat16):
    """PyTorch-equivalent up2: u (N, C, L) -> (N, C, 2L), linear, align_corners=True."""
    n, c, L = u.shape
    Lout = 2 * L
    R = n * c
    x_item = jnp.dtype(u.dtype).itemsize
    m_item = jnp.dtype(operand_dtype).itemsize

    # Column tile over the output length: bounds the resident M slice for large L.
    tn = Lout if Lout <= _MAX_COL_TILE else _MAX_COL_TILE
    ncol = pl.cdiv(Lout, tn)

    # Row block from the VMEM budget (Pallas double-buffers every pipelined operand):
    #   2*br*L*x_item (x) + 2*br*tn*x_item (out) + 2*L*tn*m_item (M) <= budget.
    m_bytes = 2 * L * tn * m_item
    per_row = 2 * L * x_item + 2 * tn * x_item
    br = max(8, min(_MAX_ROW_BLOCK, max(0, _VMEM_BUDGET - m_bytes) // per_row))
    if R > 8:
        # Guarantee >= 2 row blocks so both v7x TensorCores get work (no-op on v5e/v6e).
        br = min(br, _round_up(pl.cdiv(R, 2), 8))
    br = max(8, (br // 8) * 8)
    br = min(br, R)                                  # R < 8: single full-extent block
    nrow = pl.cdiv(R, br)

    x2d = u.reshape(R, L)                            # free metadata reshape (contiguous)
    m = _interp_matrix(L, operand_dtype)             # constant, folded by XLA

    cost = pl.CostEstimate(
        flops=4 * R * L * L,                         # dense formulation: L MACs / output
        transcendentals=0,
        bytes_accessed=x_item * (R * L + R * Lout) + m_item * L * Lout)

    out2d = pl.pallas_call(
        _up2_kernel,
        out_shape=jax.ShapeDtypeStruct((R, Lout), u.dtype),
        grid=(nrow, ncol),                           # column axis innermost: x block is
        in_specs=[                                   # DMA'd once per row block
            pl.BlockSpec((br, L), lambda i, j: (i, 0)),
            pl.BlockSpec((L, tn), lambda i, j: (0, j)),
        ],
        out_specs=pl.BlockSpec((br, tn), lambda i, j: (i, j)),
        compiler_params=pltpu.CompilerParams(
            dimension_semantics=("parallel", "parallel"),
            vmem_limit_bytes=_VMEM_LIMIT_BYTES),
        cost_estimate=cost,
    )(x2d, m)

    return out2d.reshape(n, c, Lout)                 # free metadata reshape (contiguous)


# ---------------------------- pure-JAX reference ---------------------------- #

def _up2_reference(u):
    n, c, L = u.shape
    Lout = 2 * L
    pos = jnp.arange(Lout, dtype=jnp.float32) * (L - 1) / (Lout - 1)
    i0 = jnp.clip(jnp.floor(pos).astype(jnp.int32), 0, max(L - 2, 0))
    i1 = jnp.minimum(i0 + 1, L - 1)
    frac = pos - i0.astype(jnp.float32)
    return u[..., i0] * (1.0 - frac) + u[..., i1] * frac


if __name__ == "__main__":
    key = jax.random.PRNGKey(0)
    u = jax.random.normal(key, (2, 8, 64), jnp.float32)   # (N, C, L)

    fwd = jax.jit(up2)
    out = jax.block_until_ready(fwd(u))

    assert out.shape == (2, 8, 128), out.shape
    assert bool(jnp.all(jnp.isfinite(out)))
    ref = _up2_reference(u)
    max_err = float(jnp.max(jnp.abs(out - ref)))
    assert bool(jnp.allclose(out, ref, rtol=2e-2, atol=2e-2)), max_err
    print("KERNEL_OK")
</pallas_src>

<mosaic_0001>
module attributes {stable_mosaic.version = 11 : i64} {
  func.func @_up2_kernel(%arg0: i32, %arg1: i32, %arg2: memref<8x64xf32, #tpu.memory_space<vmem>>, %arg3: memref<64x128xbf16, #tpu.memory_space<vmem>>, %arg4: memref<8x128xf32, #tpu.memory_space<vmem>>) attributes {dimension_semantics = [#tpu.dimension_semantics<parallel>, #tpu.dimension_semantics<parallel>], iteration_bounds = array<i64: 2, 1>, scalar_prefetch = 0 : i64, scratch_operands = 0 : i64, tpu.core_type = #tpu.core_type<tc>, window_params = [{transform_indices = @transform_0, window_bounds = array<i64: 8, 64>}, {transform_indices = @transform_1, window_bounds = array<i64: 64, 128>}, {transform_indices = @transform_2, window_bounds = array<i64: 8, 128>}]} {
    %c0 = arith.constant 0 : index
    %c0_0 = arith.constant 0 : index
    %0 = vector.load %arg2[%c0, %c0_0] : memref<8x64xf32, #tpu.memory_space<vmem>>, vector<8x64xf32>
    %1 = arith.truncf %0 : vector<8x64xf32> to vector<8x64xbf16>
    %c0_1 = arith.constant 0 : index
    %c0_2 = arith.constant 0 : index
    %2 = vector.load %arg3[%c0_1, %c0_2] : memref<64x128xbf16, #tpu.memory_space<vmem>>, vector<64x128xbf16>
    %cst = arith.constant dense<0.000000e+00> : vector<8x128xf32>
    %3 = tpu.matmul %1, %2, %cst {dimension_numbers = #tpu.dot_dimension_numbers<[1], [0], [0], [1], [0, 0, 1, 1], [], []>} : vector<8x64xbf16>, vector<64x128xbf16>, vector<8x128xf32> -> vector<8x128xf32>
    %c0_3 = arith.constant 0 : index
    %c0_4 = arith.constant 0 : index
    %4 = vector.load %arg4[%c0_3, %c0_4] : memref<8x128xf32, #tpu.memory_space<vmem>>, vector<8x128xf32>
    tpu.vector_store %arg4[%c0_3, %c0_4], %3 {strides = array<i32>} : memref<8x128xf32, #tpu.memory_space<vmem>>, vector<8x128xf32>,
    return
  }
  func.func @transform_0(%arg0: i32, %arg1: i32) -> (i32, i32) {
    %c0_i32 = arith.constant 0 : i32
    %c0_i32_0 = arith.constant 0 : i32
    return %arg0, %c0_i32 : i32, i32
  }
  func.func @transform_1(%arg0: i32, %arg1: i32) -> (i32, i32) {
    %c0_i32 = arith.constant 0 : i32
    %c0_i32_0 = arith.constant 0 : i32
    return %c0_i32, %arg1 : i32, i32
  }
  func.func @transform_2(%arg0: i32, %arg1: i32) -> (i32, i32) {
    %c0_i32 = arith.constant 0 : i32
    return %arg0, %arg1 : i32, i32
  }
}

</mosaic_0001>

<bundles_post_ra>
// kernel: up2.1
= control target key start
LH: loop header
LB: loop body
LE: loop exit
PB: predicated region body
PF: predicated region fallthrough
CT: control target
= control target key end

     0   :  { %7 = vsyncpa [#allocation3], 0  ;;  %s662_s0 = inlined_call_operand.vmem [shape: f32[16,64], index: 0, kind: input, shape index: {}]   ;;  %s663_s1 = inlined_call_operand.vmem [shape: bf16[64,128], index: 1, kind: input, shape index: {}]   ;;  %s664_s2 = inlined_call_operand.hbm [shape: f32[16,128], index: 2, kind: output, shape index: {}]  }
   0x1   :  { %9 = vsyncpa [#allocation3 + $0x1], 0  ;;  %s539_s9 = smov 0   ;;  %s541_s10 = smov 0  }
   0x2   :  { %s543_s11 = smov 0   ;;  %s545_s12 = smov 0  }
   0x3   :  { %s547_s13 = smov 0   ;;  %s549_s14 = smov 0  }
   0x4 LB: > { %s348_s15 = sadd.s32 4294967295, %s519_s14   ;;  %s349_s16 = sadd.s32 4294967294, %s519_s14   ;;  %s519_s14 = sphi %s549_s14, %s15_s14   ;;  %s515_s13 = sphi %s547_s13, %s671_s13   ;;  %s511_s12 = sphi %s545_s12, %s670_s12   ;;  %s507_s11 = sphi %s543_s11, %s669_s11   ;;  %s503_s10 = sphi %s541_s10, %s668_s10   ;;  %s499_s9 = sphi %s539_s9, %s667_s9  }
   0x5   : > { %s27_s17 = sadd.s32 1, %s515_s13  ;;  %s88_s18 = sadd.s32 1, %s507_s11 }
   0x6   : > { %p29_p0 = scmp.ge.s32.totalorder %s27_s17, 2  ;;  %p98_p1 = scmp.ne.s32.totalorder %s507_s11, %s503_s10 }
   0x7   : > { %p99_p2 = scmp.eq.s32.totalorder %s348_s15, 1  ;;  %p104_p3 = scmp.ne.s32.totalorder %s503_s10, %s499_s9 }
   0x8   : > { %s673_s17 = smov (%p29_p0, %s27_s17), 0  ;;  %p105_p5 = scmp.eq.s32.totalorder %s349_s16, 1 }
   0x9   : > { %p579_p4 = por %p99_p2, %p98_p1  ;;  %s83_s20 = ssub.s32 %s515_s13, %s673_s17 }
   0xa   : > { %p353_p6 = scmp.ge.s32.totalorder %s519_s14, 1  ;;  %p86_p7 = scmp.eq.s32.totalorder %s83_s20, 0 }
   0xb   : > { %p586_p8 = por %p105_p5, %p104_p3  ;;  %p137_p9 = scmp.lt.s32.totalorder %s519_s14, 3 }
   0xc   : > { %s592_s22 = scalar_select %p86_p7, %s507_s11, %s88_s18  }
   0xd   : > { %p138_p10 = pnand %p353_p6, %p137_p9 }
   0xe   : > { %p162_p11 = scmp.lt.s32.totalorder (!%p138_p10), %s511_s12, 1  ;;  %s159_s8 = sand.u32 (!%p138_p10), 1, %s503_s10  }
   0xf   : > { %141 = sbr.rel (%p138_p10) target bundleno = 246 (0xf6), region = 28  ;;  %s354_s15 = sshll.u32 (!%p138_p10), %s159_s8, 3 }
  0x10   : > { %s161_s16 = scalar_lea.vmem (!%p138_p10), [#allocation2], %s354_s15  ;;  %s362_s20 = sshll.u32 (!%p138_p10), %s511_s12, 7 }
  0x11   : > { %s265_s18 = sshll.u32 (!%p138_p10), %s161_s16, 4  ;;  %s618_s25 = scalar_lea.hbm (!%p138_p10), %s664_s2, %s362_s20  ;;  %s613_s18 = int_to_ptr.vmem [resolvable:$true] %s265_s18 }
  0x12   : > { %s251_s26 = scalar_lea.sflag (!%p138_p10), [#allocation3], %s159_s8 }
  0x14   : > { %v439_v0 = vld [vmem:[%s663_s1 + $0x18] sm:$0xff]   ;;  %v521_v1 = vmov 0.0   ;;  %v440_v2 = vld [vmem:[%s663_s1 + $0x10] sm:$0xff]   ;;  %vm522_vm0 = vmmov 0   ;;  %s163_s27 = scalar_select %p162_p11, %s511_s12, 1  ;;  %v441_v3 = vld [vmem:[%s663_s1 + $0x8] sm:$0xff]  }
  0x15   : > { %370 = vmatprep.subr.bf16.mxu0 %v521_v1  ;;  %378 = vmatprep.mubr.msk.bf16.mxu0 %vm522_vm0, %v521_v1  ;;  %v442_v4 = vld [vmem:[%s663_s1] sm:$0xff]   ;;  %vm205_vm1 = vcmask 523264   ;;  %s523_s12 = smov [#allocation2]  }
  0x16   : > { %371 = vmatpush3.bf16.msra.mxu0 %v439_v0  ;;  %s355_s30 = sshll.u32 %s163_s27, 3  ;;  %s443_s27 = scalar_lea.vmem %s613_s18, 128 }
  0x17   : > { %372 = vmatprep.subr.bf16.mxu0 %v521_v1  ;;  %s165_s5 = scalar_lea.vmem %s662_s0, %s355_s30  ;;  %p444_p12 = scmp.ne.s32.totalorder %s613_s18, %s443_s27 }
  0x18   : > { %v171_v5 = vld [vmem:[%s165_s5] sm:$0xff]  ;;  %s447_s28 = sshll.u32 %s523_s12, 4  ;;  %s448_s28 = int_to_ptr.vmem [resolvable:$false] %s447_s28 }
  0x19   : > { %v172_v6 = vpack.c.bf16 %v171_v5, %v171_v5  ;;  %p445_p13 = pnand %p444_p12, %p579_p4  ;;  %s449_s29 = scalar_lea.vmem %s448_s28, 256 }
  0x1a   : > { %373 = vmatpush3.bf16.msra.mxu0 %v440_v2  ;;  %p450_p1 = scmp.lt.s32.totalorder %s613_s18, %s448_s28  ;;  %p451_p2 = scmp.lt.s32.totalorder %s449_s29, %s443_s27 }
  0x1b   : > { %374 = vmatprep.subr.bf16.mxu0 %v521_v1  ;;  %p446_p0 = pneg %p445_p13 }
  0x1c   : > { %p452_p3 = por %p451_p2, %p450_p1 }
  0x1e   : > { %375 = vmatpush3.bf16.msra.mxu0 %v441_v3  ;;  %p453_p5 = pnand %p452_p3, %p446_p0 }
  0x1f   : > { %376 = vmatprep.subr.bf16.mxu0 %v521_v1 }
  0x22   : > { %377 = vmatpush3.bf16.msra.mxu0 %v442_v4 }
  0x25   : > { %379 = vmatmul.mubr.msk.bf16.vlgmr.msra.gmra.mxu0 %vm205_vm1, %v172_v6 }
  0xe5   : > { %v243_v7 = vpop.f32.mrf.mxu0 }
  0xe6   : > { %249 = vst [vmem:[%s161_s16] sm:$0xff] %v243_v7 }
  0xe7   : > { %v380_v8 = vpop.f32.mrf.mxu0 }
  0xe8   : > { %456 = shalt.err (!%p453_p5)
}
  0xe9   : > { %s457_s30 = scalar_lea.hbm %s618_s25, 128  ;;  %s461_s5 = scalar_lea.hbm %s664_s2, 256 }
  0xea   : > { %p458_p6 = scmp.ne.s32.totalorder %s618_s25, %s457_s30  ;;  %p462_p10 = scmp.lt.s32.totalorder %s618_s25, %s664_s2 }
  0xeb   : > { %p463_p11 = scmp.lt.s32.totalorder %s461_s5, %s457_s30 }
  0xec   : > { %p459_p7 = pnand %p458_p6, %p579_p4 }
  0xed   : > { %p464_p12 = por %p463_p11, %p462_p10 }
  0xee   : > { %p460_p9 = pneg %p459_p7 }
  0xf0   : > { %p465_p13 = pnand %p464_p12, %p460_p9 }
  0xf2   : > { %468 = shalt.err (!%p465_p13)
}
  0xf3   : > { %382 = dma.vmem_to_hbm [thread:$0]  (%p579_p4), %s613_s18, 128, %s618_s25, %s251_s26   ;;  %v246_v9 = vpop.f32.mrf.mxu0 }
  0xf5   : > { %v381_v10 = vpop.f32.mrf.mxu0 }
  0xf6 PF: > { %p388_p0 = scmp.ge.s32.totalorder %s519_s14, 2  ;;  %s277_s8 = sand.u32 1, %s499_s9  }
  0xf7   : > { %s278_s15 = scalar_lea.sflag [#allocation3], %s277_s8 }
  0xf8   : > { %p385_p1 = pnand %p388_p0, %p586_p8 }
  0xfa   : > { %p386_p2 = pneg %p385_p1 }
  0xfc   : > { %494 = dma.done.wait (%p386_p2), %s278_s15, 128  }
  0xfd   : > { %496 = vsyncadd (%p386_p2), %s278_s15, 4294967168  ;;  %s15_s14 = sadd.s32 1, %s519_s14   ;;  %s667_s9 = smov %s503_s10 }
  0xfe   : > { %p12_p3 = scmp.ge.s32.totalorder %s15_s14, 4   ;;  %s668_s10 = smov %s507_s11 }
  0xff   : > { %s669_s11 = smov %s592_s22  ;;  %s670_s12 = smov %s515_s13 }
 0x100   : > { %s671_s13 = smov %s673_s17  ;;  %14 = sbr.rel (!%p12_p3) target bundleno = 4 (0x4), region = 66 }
 0x105   :  { %283 = vsyncpa [#allocation3], 1 }
 0x106   :  { %285 = vsyncpa [#allocation3 + $0x1], 1 }

</bundles_post_ra>
